<compile_context>
chip_gen: v5e
topology: v5e:2x2
jax: 0.10.0
libtpu: 0.0.40
codegen_flags: <defaults>
</compile_context>

<pallas_src>
import jax
import jax.numpy as jnp
import numpy as np
from jax.experimental import pallas as pl
from jax.experimental.pallas import tpu as pltpu


def res1d_kernel(x_ref, w1_ref, b1_ref, w2_ref, b2_ref, out_ref, col_ref):
    """Fused Res1DBlock for a tile of N_tile samples, batch folded into lanes.

    x_ref  : (N_tile, C_in, L)      f32  input (also the identity skip)
    w1_ref : (C_out, ks*C_in)       bf16 conv1 weights, tap-major im2col layout
    b1_ref : (C_out, 1)             f32
    w2_ref : (C_out, ks*C_out)      bf16 conv2 weights
    b2_ref : (C_out, 1)             f32
    out_ref: (N_tile, C_out, L)     f32
    col_ref: (ks*C_in, N_tile*L)    bf16 VMEM scratch, im2col RHS (reused by both convs)
    """
    Nt, C, L = x_ref.shape
    ks = w1_ref.shape[1] // C
    pad = ks // 2
    W = Nt * L

    # Fold the batch tile into the lane axis: (Nt, C, L) -> (C, Nt*L).  VMEM-internal
    # relayout only; HBM I/O stays in native NCL layout.
    xw = jnp.concatenate([x_ref[n] for n in range(Nt)], axis=-1)  # (C, W) f32

    # Lane position within each sample + per-tap boundary masks, computed ONCE and
    # shared by both convs (prevents rolls leaking across sample boundaries).
    pos = jax.lax.broadcasted_iota(jnp.int32, (C, W), 1) % L
    masks = []
    for k in range(ks):
        s = pad - k
        if s == 0:
            masks.append(None)
        elif s > 0:
            masks.append(pos >= s)          # zero the first s columns of each sample
        else:
            masks.append(pos < L + s)       # zero the last -s columns of each sample

    def im2col_into_scratch(v):
        # v: (C, W) f32.  Build the im2col RHS (row k*C + c = tap k of channel c)
        # directly in the bf16 VMEM scratch via slice-assign.
        for k in range(ks):
            s = pad - k                      # col_k[:, p] = v[:, p + k - pad] within a sample
            t = v if s == 0 else pltpu.roll(v, s % W, 1)
            if masks[k] is not None:
                t = jnp.where(masks[k], t, jnp.zeros_like(t))
            col_ref[k * C:(k + 1) * C, :] = t.astype(jnp.bfloat16)
        return col_ref[...]

    # conv1( relu(x) ) : one wide MXU matmul, K = ks*C, f32 accumulate, bias epilogue.
    a1 = im2col_into_scratch(jnp.maximum(xw, 0.0))
    h = jnp.dot(w1_ref[...], a1, preferred_element_type=jnp.float32) + b1_ref[...]

    # conv2( relu(h) )
    a2 = im2col_into_scratch(jnp.maximum(h, 0.0))
    y = jnp.dot(w2_ref[...], a2, preferred_element_type=jnp.float32) + b2_ref[...]

    # identity shortcut (stride == 1, in_c == out_c), then scatter back to NCL layout.
    res = xw + y                              # (C, W) f32
    for n in range(Nt):
        out_ref[n] = res[:, n * L:(n + 1) * L]


def _pick_n_tile(n, c, l, ks, budget_bytes):
    """Largest divisor of n whose per-step working set fits the VMEM budget,
    preferring >= 2 grid steps so v7x megacore can shard the 'parallel' axis."""
    per_n = c * l * (42 + 2 * ks)             # rough bytes / sample / step (incl. dbl-buffered I/O)
    cap = max(1, budget_bytes // per_n)
    divs = [d for d in range(1, n + 1) if n % d == 0 and d <= cap]
    pref = [d for d in divs if n // d >= 2]
    return max(pref) if pref else max(divs)


def res1d_block(x, w1, b1, w2, b2, kernel_sz, n_tile=None, vmem_budget_bytes=8 << 20):
    """x: (N, C_in, L) f32, PyTorch NCL layout. w: (out_c, in_c, ks). Returns (N, C_out, L) f32."""
    N, C_in, L = x.shape
    C_out = w1.shape[0]
    ks = kernel_sz
    assert ks % 2 == 1, "padding='auto' residual add requires odd kernel_sz"
    assert C_in == C_out, "identity-shortcut variant only (stride=1, in_c==out_c)"
    # TODO(synk): conv shortcut / bn branches not implemented.

    if n_tile is None:
        n_tile = _pick_n_tile(N, C_in, L, ks, vmem_budget_bytes)
    assert N % n_tile == 0, "n_tile must divide N (pad the batch upstream otherwise)"

    # Weight re-layout for the im2col contraction: W2d[o, k*C + c] = W[o, c, k].
    w1_2d = jnp.transpose(w1, (0, 2, 1)).reshape(C_out, ks * C_in).astype(jnp.bfloat16)
    w2_2d = jnp.transpose(w2, (0, 2, 1)).reshape(C_out, ks * C_out).astype(jnp.bfloat16)
    b1r = b1.reshape(C_out, 1).astype(jnp.float32)
    b2r = b2.reshape(C_out, 1).astype(jnp.float32)
    xf = x.astype(jnp.float32)

    return pl.pallas_call(
        res1d_kernel,
        out_shape=jax.ShapeDtypeStruct((N, C_out, L), jnp.float32),
        grid=(N // n_tile,),
        in_specs=[
            pl.BlockSpec((n_tile, C_in, L), lambda i: (i, 0, 0)),     # x tile (single DMA)
            pl.BlockSpec((C_out, ks * C_in), lambda i: (0, 0)),       # w1 (resident)
            pl.BlockSpec((C_out, 1), lambda i: (0, 0)),               # b1
            pl.BlockSpec((C_out, ks * C_out), lambda i: (0, 0)),      # w2
            pl.BlockSpec((C_out, 1), lambda i: (0, 0)),               # b2
        ],
        out_specs=pl.BlockSpec((n_tile, C_out, L), lambda i: (i, 0, 0)),
        scratch_shapes=[pltpu.VMEM((ks * C_in, n_tile * L), jnp.bfloat16)],
        compiler_params=pltpu.CompilerParams(
            dimension_semantics=("parallel",)),                        # megacore on v7x
    )(xf, w1_2d, b1r, w2_2d, b2r)


def res1d_reference(x, w1, b1, w2, b2, ks):
    """Pure-JAX reference matching torch Res1DBlock.forward (bn=False, relu),
    mirroring the kernel's bf16 rounding of matmul operands (f32 accumulation)."""
    pad = ks // 2
    f32 = jnp.float32
    w1b = w1.astype(jnp.bfloat16).astype(f32)
    w2b = w2.astype(jnp.bfloat16).astype(f32)

    def conv1d(a, w, b):
        y = jax.lax.conv_general_dilated(
            a, w, window_strides=(1,), padding=[(pad, pad)],
            dimension_numbers=('NCH', 'OIH', 'NCH'),
            precision=jax.lax.Precision.HIGHEST)
        return y + b[None, :, None]

    a1 = jnp.maximum(x, 0.0).astype(jnp.bfloat16).astype(f32)
    h = conv1d(a1, w1b, b1)
    a2 = jnp.maximum(h, 0.0).astype(jnp.bfloat16).astype(f32)
    y = conv1d(a2, w2b, b2)
    return x + y


if __name__ == "__main__":
    # Res1DBlock(in_c=16, out_c=16, kernel_sz=3) -> identity shortcut.
    # Small demo shapes; L a multiple of 128 so the length axis is lane-dense.
    # N=8 lets the wrapper pick n_tile=4 -> grid of 2 steps (>=2 for v7x megacore).
    N, C, L, KS = 8, 16, 128, 3

    key = jax.random.PRNGKey(0)
    kx, k1, k2, kb1, kb2 = jax.random.split(key, 5)
    x = jax.random.normal(kx, (N, C, L), dtype=jnp.float32)

    fan_in = C * KS  # kaiming-normal-ish deterministic init
    w1 = jax.random.normal(k1, (C, C, KS), dtype=jnp.float32) * np.sqrt(2.0 / fan_in)
    w2 = jax.random.normal(k2, (C, C, KS), dtype=jnp.float32) * np.sqrt(2.0 / fan_in)
    # Non-zero biases to exercise the bias epilogue (module init is zeros).
    b1 = 0.1 * jax.random.normal(kb1, (C,), dtype=jnp.float32)
    b2 = 0.1 * jax.random.normal(kb2, (C,), dtype=jnp.float32)

    out = jax.block_until_ready(res1d_block(x, w1, b1, w2, b2, kernel_sz=KS))

    ref = res1d_reference(x, w1, b1, w2, b2, ks=KS)
    np.testing.assert_allclose(np.asarray(out), np.asarray(ref),
                               rtol=2e-3, atol=2e-3)
    print("KERNEL_OK")
</pallas_src>

<mosaic_0001>
module attributes {stable_mosaic.version = 11 : i64} {
  func.func @res1d_kernel(%arg0: i32, %arg1: memref<4x16x128xf32, #tpu.memory_space<vmem>>, %arg2: memref<16x48xbf16, #tpu.memory_space<vmem>>, %arg3: memref<16x1xf32, #tpu.memory_space<vmem>>, %arg4: memref<16x48xbf16, #tpu.memory_space<vmem>>, %arg5: memref<16x1xf32, #tpu.memory_space<vmem>>, %arg6: memref<4x16x128xf32, #tpu.memory_space<vmem>>, %arg7: memref<48x512xbf16, #tpu.memory_space<vmem>>) attributes {dimension_semantics = [#tpu.dimension_semantics<parallel>], iteration_bounds = array<i64: 2>, scalar_prefetch = 0 : i64, scratch_operands = 1 : i64, tpu.core_type = #tpu.core_type<tc>, window_params = [{transform_indices = @transform_0, window_bounds = array<i64: 4, 16, 128>}, {pipeline_mode = #tpu.pipeline_mode<synchronous>, transform_indices = @transform_1, window_bounds = array<i64: 16, 48>}, {pipeline_mode = #tpu.pipeline_mode<synchronous>, transform_indices = @transform_2, window_bounds = array<i64: 16, 1>}, {pipeline_mode = #tpu.pipeline_mode<synchronous>, transform_indices = @transform_3, window_bounds = array<i64: 16, 48>}, {pipeline_mode = #tpu.pipeline_mode<synchronous>, transform_indices = @transform_4, window_bounds = array<i64: 16, 1>}, {transform_indices = @transform_5, window_bounds = array<i64: 4, 16, 128>}]} {
    %c0 = arith.constant 0 : index
    %c0_0 = arith.constant 0 : index
    %c0_1 = arith.constant 0 : index
    %0 = vector.load %arg1[%c0, %c0_0, %c0_1] : memref<4x16x128xf32, #tpu.memory_space<vmem>>, vector<1x16x128xf32>
    %1 = vector.shape_cast %0 : vector<1x16x128xf32> to vector<16x128xf32>
    %c1 = arith.constant 1 : index
    %c0_2 = arith.constant 0 : index
    %c0_3 = arith.constant 0 : index
    %2 = vector.load %arg1[%c1, %c0_2, %c0_3] : memref<4x16x128xf32, #tpu.memory_space<vmem>>, vector<1x16x128xf32>
    %3 = vector.shape_cast %2 : vector<1x16x128xf32> to vector<16x128xf32>
    %c2 = arith.constant 2 : index
    %c0_4 = arith.constant 0 : index
    %c0_5 = arith.constant 0 : index
    %4 = vector.load %arg1[%c2, %c0_4, %c0_5] : memref<4x16x128xf32, #tpu.memory_space<vmem>>, vector<1x16x128xf32>
    %5 = vector.shape_cast %4 : vector<1x16x128xf32> to vector<16x128xf32>
    %c3 = arith.constant 3 : index
    %c0_6 = arith.constant 0 : index
    %c0_7 = arith.constant 0 : index
    %6 = vector.load %arg1[%c3, %c0_6, %c0_7] : memref<4x16x128xf32, #tpu.memory_space<vmem>>, vector<1x16x128xf32>
    %7 = vector.shape_cast %6 : vector<1x16x128xf32> to vector<16x128xf32>
    %8 = tpu.concatenate %1, %3, %5, %7 in 1 : vector<16x128xf32>, vector<16x128xf32>, vector<16x128xf32>, vector<16x128xf32> -> vector<16x512xf32>
    %9 = tpu.iota {dimensions = array<i32: 1>} : vector<16x512xi32>
    %c128_i32 = arith.constant 128 : i32
    %c0_i32 = arith.constant 0 : i32
    %10 = arith.cmpi eq, %c128_i32, %c0_i32 : i32
    %c1_i32 = arith.constant 1 : i32
    %11 = arith.select %10, %c1_i32, %c128_i32 : i32
    %12 = vector.broadcast %11 : i32 to vector<16x512xi32>
    %13 = arith.remsi %9, %12 : vector<16x512xi32>
    %c0_i32_8 = arith.constant 0 : i32
    %14 = vector.broadcast %c0_i32_8 : i32 to vector<16x512xi32>
    %15 = arith.cmpi ne, %13, %14 : vector<16x512xi32>
    %c0_i32_9 = arith.constant 0 : i32
    %16 = vector.broadcast %c0_i32_9 : i32 to vector<16x512xi32>
    %17 = arith.cmpi slt, %13, %16 : vector<16x512xi32>
    %c0_i32_10 = arith.constant 0 : i32
    %18 = arith.cmpi slt, %11, %c0_i32_10 : i32
    %19 = vector.broadcast %18 : i1 to vector<16x512xi1>
    %20 = vector.broadcast %19 : vector<16x512xi1> to vector<16x512xi1>
    %21 = arith.xori %17, %20 : vector<16x512xi1>
    %22 = arith.andi %21, %15 : vector<16x512xi1>
    %23 = vector.broadcast %11 : i32 to vector<16x512xi32>
    %24 = arith.addi %13, %23 : vector<16x512xi32>
    %25 = arith.select %22, %24, %13 : vector<16x512xi1>, vector<16x512xi32>
    %c1_i32_11 = arith.constant 1 : i32
    %26 = vector.broadcast %c1_i32_11 : i32 to vector<16x512xi32>
    %27 = arith.cmpi sge, %25, %26 : vector<16x512xi32>
    %c127_i32 = arith.constant 127 : i32
    %28 = vector.broadcast %c127_i32 : i32 to vector<16x512xi32>
    %29 = arith.cmpi slt, %25, %28 : vector<16x512xi32>
    %cst = arith.constant 0.000000e+00 : f32
    %30 = vector.broadcast %cst : f32 to vector<16x512xf32>
    %31 = arith.maximumf %8, %30 : vector<16x512xf32>
    %c1_i32_12 = arith.constant 1 : i32
    %32 = tpu.dynamic_rotate %31 by %c1_i32_12 dim 1 : vector<16x512xf32>, i32 -> vector<16x512xf32>
    %cst_13 = arith.constant 0.000000e+00 : f32
    %33 = vector.broadcast %cst_13 : f32 to vector<16x512xf32>
    %34 = arith.select %27, %32, %33 : vector<16x512xi1>, vector<16x512xf32>
    %35 = arith.truncf %34 : vector<16x512xf32> to vector<16x512xbf16>
    %c0_14 = arith.constant 0 : index
    %c0_15 = arith.constant 0 : index
    %36 = vector.load %arg7[%c0_14, %c0_15] : memref<48x512xbf16, #tpu.memory_space<vmem>>, vector<16x512xbf16>
    tpu.vector_store %arg7[%c0_14, %c0_15], %35 {strides = array<i32>} : memref<48x512xbf16, #tpu.memory_space<vmem>>, vector<16x512xbf16>,
    %37 = arith.truncf %31 : vector<16x512xf32> to vector<16x512xbf16>
    %c16 = arith.constant 16 : index
    %c0_16 = arith.constant 0 : index
    %38 = vector.load %arg7[%c16, %c0_16] : memref<48x512xbf16, #tpu.memory_space<vmem>>, vector<16x512xbf16>
    tpu.vector_store %arg7[%c16, %c0_16], %37 {strides = array<i32>} : memref<48x512xbf16, #tpu.memory_space<vmem>>, vector<16x512xbf16>,
    %c511_i32 = arith.constant 511 : i32
    %39 = tpu.dynamic_rotate %31 by %c511_i32 dim 1 : vector<16x512xf32>, i32 -> vector<16x512xf32>
    %cst_17 = arith.constant 0.000000e+00 : f32
    %40 = vector.broadcast %cst_17 : f32 to vector<16x512xf32>
    %41 = arith.select %29, %39, %40 : vector<16x512xi1>, vector<16x512xf32>
    %42 = arith.truncf %41 : vector<16x512xf32> to vector<16x512xbf16>
    %c32 = arith.constant 32 : index
    %c0_18 = arith.constant 0 : index
    %43 = vector.load %arg7[%c32, %c0_18] : memref<48x512xbf16, #tpu.memory_space<vmem>>, vector<16x512xbf16>
    tpu.vector_store %arg7[%c32, %c0_18], %42 {strides = array<i32>} : memref<48x512xbf16, #tpu.memory_space<vmem>>, vector<16x512xbf16>,
    %c0_19 = arith.constant 0 : index
    %c0_20 = arith.constant 0 : index
    %44 = vector.load %arg7[%c0_19, %c0_20] : memref<48x512xbf16, #tpu.memory_space<vmem>>, vector<48x512xbf16>
    %c0_21 = arith.constant 0 : index
    %c0_22 = arith.constant 0 : index
    %45 = vector.load %arg2[%c0_21, %c0_22] : memref<16x48xbf16, #tpu.memory_space<vmem>>, vector<16x48xbf16>
    %cst_23 = arith.constant dense<0.000000e+00> : vector<16x512xf32>
    %46 = tpu.matmul %45, %44, %cst_23 {dimension_numbers = #tpu.dot_dimension_numbers<[1], [0], [0], [1], [0, 0, 1, 1], [], []>} : vector<16x48xbf16>, vector<48x512xbf16>, vector<16x512xf32> -> vector<16x512xf32>
    %c0_24 = arith.constant 0 : index
    %c0_25 = arith.constant 0 : index
    %47 = vector.load %arg3[%c0_24, %c0_25] : memref<16x1xf32, #tpu.memory_space<vmem>>, vector<16x1xf32>
    %48 = vector.broadcast %47 : vector<16x1xf32> to vector<16x512xf32>
    %49 = arith.addf %46, %48 : vector<16x512xf32>
    %cst_26 = arith.constant 0.000000e+00 : f32
    %50 = vector.broadcast %cst_26 : f32 to vector<16x512xf32>
    %51 = arith.maximumf %49, %50 : vector<16x512xf32>
    %c1_i32_27 = arith.constant 1 : i32
    %52 = tpu.dynamic_rotate %51 by %c1_i32_27 dim 1 : vector<16x512xf32>, i32 -> vector<16x512xf32>
    %cst_28 = arith.constant 0.000000e+00 : f32
    %53 = vector.broadcast %cst_28 : f32 to vector<16x512xf32>
    %54 = arith.select %27, %52, %53 : vector<16x512xi1>, vector<16x512xf32>
    %55 = arith.truncf %54 : vector<16x512xf32> to vector<16x512xbf16>
    %c0_29 = arith.constant 0 : index
    %c0_30 = arith.constant 0 : index
    %56 = vector.load %arg7[%c0_29, %c0_30] : memref<48x512xbf16, #tpu.memory_space<vmem>>, vector<16x512xbf16>
    tpu.vector_store %arg7[%c0_29, %c0_30], %55 {strides = array<i32>} : memref<48x512xbf16, #tpu.memory_space<vmem>>, vector<16x512xbf16>,
    %57 = arith.truncf %51 : vector<16x512xf32> to vector<16x512xbf16>
    %c16_31 = arith.constant 16 : index
    %c0_32 = arith.constant 0 : index
    %58 = vector.load %arg7[%c16_31, %c0_32] : memref<48x512xbf16, #tpu.memory_space<vmem>>, vector<16x512xbf16>
    tpu.vector_store %arg7[%c16_31, %c0_32], %57 {strides = array<i32>} : memref<48x512xbf16, #tpu.memory_space<vmem>>, vector<16x512xbf16>,
    %c511_i32_33 = arith.constant 511 : i32
    %59 = tpu.dynamic_rotate %51 by %c511_i32_33 dim 1 : vector<16x512xf32>, i32 -> vector<16x512xf32>
    %cst_34 = arith.constant 0.000000e+00 : f32
    %60 = vector.broadcast %cst_34 : f32 to vector<16x512xf32>
    %61 = arith.select %29, %59, %60 : vector<16x512xi1>, vector<16x512xf32>
    %62 = arith.truncf %61 : vector<16x512xf32> to vector<16x512xbf16>
    %c32_35 = arith.constant 32 : index
    %c0_36 = arith.constant 0 : index
    %63 = vector.load %arg7[%c32_35, %c0_36] : memref<48x512xbf16, #tpu.memory_space<vmem>>, vector<16x512xbf16>
    tpu.vector_store %arg7[%c32_35, %c0_36], %62 {strides = array<i32>} : memref<48x512xbf16, #tpu.memory_space<vmem>>, vector<16x512xbf16>,
    %c0_37 = arith.constant 0 : index
    %c0_38 = arith.constant 0 : index
    %64 = vector.load %arg7[%c0_37, %c0_38] : memref<48x512xbf16, #tpu.memory_space<vmem>>, vector<48x512xbf16>
    %c0_39 = arith.constant 0 : index
    %c0_40 = arith.constant 0 : index
    %65 = vector.load %arg4[%c0_39, %c0_40] : memref<16x48xbf16, #tpu.memory_space<vmem>>, vector<16x48xbf16>
    %cst_41 = arith.constant dense<0.000000e+00> : vector<16x512xf32>
    %66 = tpu.matmul %65, %64, %cst_41 {dimension_numbers = #tpu.dot_dimension_numbers<[1], [0], [0], [1], [0, 0, 1, 1], [], []>} : vector<16x48xbf16>, vector<48x512xbf16>, vector<16x512xf32> -> vector<16x512xf32>
    %c0_42 = arith.constant 0 : index
    %c0_43 = arith.constant 0 : index
    %67 = vector.load %arg5[%c0_42, %c0_43] : memref<16x1xf32, #tpu.memory_space<vmem>>, vector<16x1xf32>
    %68 = vector.broadcast %67 : vector<16x1xf32> to vector<16x512xf32>
    %69 = arith.addf %66, %68 : vector<16x512xf32>
    %70 = arith.addf %8, %69 : vector<16x512xf32>
    %71 = vector.extract_strided_slice %70 {offsets = [0, 0], sizes = [16, 128], strides = [1, 1]} : vector<16x512xf32> to vector<16x128xf32>
    %c0_44 = arith.constant 0 : index
    %c0_45 = arith.constant 0 : index
    %c0_46 = arith.constant 0 : index
    %72 = vector.load %arg6[%c0_44, %c0_45, %c0_46] : memref<4x16x128xf32, #tpu.memory_space<vmem>>, vector<1x16x128xf32>
    %73 = vector.shape_cast %72 : vector<1x16x128xf32> to vector<16x128xf32>
    %74 = vector.shape_cast %71 : vector<16x128xf32> to vector<1x16x128xf32>
    tpu.vector_store %arg6[%c0_44, %c0_45, %c0_46], %74 {strides = array<i32>} : memref<4x16x128xf32, #tpu.memory_space<vmem>>, vector<1x16x128xf32>,
    %75 = vector.extract_strided_slice %70 {offsets = [0, 128], sizes = [16, 128], strides = [1, 1]} : vector<16x512xf32> to vector<16x128xf32>
    %c1_47 = arith.constant 1 : index
    %c0_48 = arith.constant 0 : index
    %c0_49 = arith.constant 0 : index
    %76 = vector.load %arg6[%c1_47, %c0_48, %c0_49] : memref<4x16x128xf32, #tpu.memory_space<vmem>>, vector<1x16x128xf32>
    %77 = vector.shape_cast %76 : vector<1x16x128xf32> to vector<16x128xf32>
    %78 = vector.shape_cast %75 : vector<16x128xf32> to vector<1x16x128xf32>
    tpu.vector_store %arg6[%c1_47, %c0_48, %c0_49], %78 {strides = array<i32>} : memref<4x16x128xf32, #tpu.memory_space<vmem>>, vector<1x16x128xf32>,
    %79 = vector.extract_strided_slice %70 {offsets = [0, 256], sizes = [16, 128], strides = [1, 1]} : vector<16x512xf32> to vector<16x128xf32>
    %c2_50 = arith.constant 2 : index
    %c0_51 = arith.constant 0 : index
    %c0_52 = arith.constant 0 : index
    %80 = vector.load %arg6[%c2_50, %c0_51, %c0_52] : memref<4x16x128xf32, #tpu.memory_space<vmem>>, vector<1x16x128xf32>
    %81 = vector.shape_cast %80 : vector<1x16x128xf32> to vector<16x128xf32>
    %82 = vector.shape_cast %79 : vector<16x128xf32> to vector<1x16x128xf32>
    tpu.vector_store %arg6[%c2_50, %c0_51, %c0_52], %82 {strides = array<i32>} : memref<4x16x128xf32, #tpu.memory_space<vmem>>, vector<1x16x128xf32>,
    %83 = vector.extract_strided_slice %70 {offsets = [0, 384], sizes = [16, 128], strides = [1, 1]} : vector<16x512xf32> to vector<16x128xf32>
    %c3_53 = arith.constant 3 : index
    %c0_54 = arith.constant 0 : index
    %c0_55 = arith.constant 0 : index
    %84 = vector.load %arg6[%c3_53, %c0_54, %c0_55] : memref<4x16x128xf32, #tpu.memory_space<vmem>>, vector<1x16x128xf32>
    %85 = vector.shape_cast %84 : vector<1x16x128xf32> to vector<16x128xf32>
    %86 = vector.shape_cast %83 : vector<16x128xf32> to vector<1x16x128xf32>
    tpu.vector_store %arg6[%c3_53, %c0_54, %c0_55], %86 {strides = array<i32>} : memref<4x16x128xf32, #tpu.memory_space<vmem>>, vector<1x16x128xf32>,
    return
  }
  func.func @transform_0(%arg0: i32) -> (i32, i32, i32) {
    %c0_i32 = arith.constant 0 : i32
    %c0_i32_0 = arith.constant 0 : i32
    %c0_i32_1 = arith.constant 0 : i32
    return %arg0, %c0_i32, %c0_i32_0 : i32, i32, i32
  }
  func.func @transform_1(%arg0: i32) -> (i32, i32) {
    %c0_i32 = arith.constant 0 : i32
    %c0_i32_0 = arith.constant 0 : i32
    %c0_i32_1 = arith.constant 0 : i32
    return %c0_i32, %c0_i32_0 : i32, i32
  }
  func.func @transform_2(%arg0: i32) -> (i32, i32) {
    %c0_i32 = arith.constant 0 : i32
    %c0_i32_0 = arith.constant 0 : i32
    %c0_i32_1 = arith.constant 0 : i32
    return %c0_i32, %c0_i32_0 : i32, i32
  }
  func.func @transform_3(%arg0: i32) -> (i32, i32) {
    %c0_i32 = arith.constant 0 : i32
    %c0_i32_0 = arith.constant 0 : i32
    %c0_i32_1 = arith.constant 0 : i32
    return %c0_i32, %c0_i32_0 : i32, i32
  }
  func.func @transform_4(%arg0: i32) -> (i32, i32) {
    %c0_i32 = arith.constant 0 : i32
    %c0_i32_0 = arith.constant 0 : i32
    %c0_i32_1 = arith.constant 0 : i32
    return %c0_i32, %c0_i32_0 : i32, i32
  }
  func.func @transform_5(%arg0: i32) -> (i32, i32, i32) {
    %c0_i32 = arith.constant 0 : i32
    %c0_i32_0 = arith.constant 0 : i32
    %c0_i32_1 = arith.constant 0 : i32
    return %arg0, %c0_i32, %c0_i32_0 : i32, i32, i32
  }
}

</mosaic_0001>

<bundles_post_ra>
// kernel: tpu_custom_call.1
= control target key start
LH: loop header
LB: loop body
LE: loop exit
PB: predicated region body
PF: predicated region fallthrough
CT: control target
= control target key end

     0   :  { %10 = vsyncpa [#allocation4], 0  ;;  %s1757_s0 = inlined_call_operand.hbm [shape: f32[8,16,128], index: 0, kind: input, shape index: {}]   ;;  %s1758_s1 = inlined_call_operand.vmem [shape: bf16[16,48], index: 1, kind: input, shape index: {}]   ;;  %s1759_s2 = inlined_call_operand.vmem [shape: f32[16,1], index: 2, kind: input, shape index: {}]   ;;  %s1760_s3 = inlined_call_operand.vmem [shape: bf16[16,48], index: 3, kind: input, shape index: {}]   ;;  %s1761_s4 = inlined_call_operand.vmem [shape: f32[16,1], index: 4, kind: input, shape index: {}]   ;;  %s1762_s5 = inlined_call_operand.hbm [shape: f32[8,16,128], index: 5, kind: output, shape index: {}]  }
   0x1   :  { %12 = vsyncpa [#allocation4 + $0x1], 0 }
   0x2   :  { %13 = vsyncpa [#allocation5], 0 }
   0x3   :  { %15 = vsyncpa [#allocation5 + $0x1], 0  ;;  %s1366_s18 = smov 0   ;;  %s1368_s19 = smov 0  }
   0x4   :  { %s1370_s20 = smov 0   ;;  %s1372_s21 = smov 0  }
   0x5 LB: > { %s1387_s22 = sadd.s32 4294967295, %s1327_s21   ;;  %s925_s23 = sadd.s32 4294967294, %s1327_s21   ;;  %s1327_s21 = sphi %s1372_s21, %s1784_s21   ;;  %s1323_s20 = sphi %s1370_s20, %s1783_s20   ;;  %s1319_s19 = sphi %s1368_s19, %s1782_s19   ;;  %s1315_s18 = sphi %s1366_s18, %s1781_s18  }
   0x6   : > { %s1391_s24 = sadd.s32 1, %s1327_s21   ;;  %s28_s25 = sadd.s32 1, %s1323_s20 }
   0x7   : > { %s25_s26 = ssub.s32 %s1327_s21, %s1391_s24  ;;  %p35_p0 = scmp.ne.s32.totalorder %s1323_s20, %s1319_s19 }
   0x8   : > { %p26_p1 = scmp.eq.s32.totalorder %s25_s26, 0  ;;  %p36_p2 = scmp.eq.s32.totalorder %s1327_s21, 0 }
   0x9   : > { %p41_p3 = scmp.ne.s32.totalorder %s1319_s19, %s1315_s18  ;;  %p42_p4 = scmp.eq.s32.totalorder %s1387_s22, 0 }
   0xa   : > { %s1403_s27 = scalar_select %p26_p1, %s1323_s20, %s28_s25  }
   0xb   : > { %p1405_p5 = por %p36_p2, %p35_p0  ;;  %p1409_p6 = por %p42_p4, %p41_p3 }
   0xc   : > { %p149_p7 = scmp.eq.s32.totalorder %s1387_s22, 1  ;;  %p155_p8 = scmp.eq.s32.totalorder %s925_s23, 1 }
   0xd   : > { %p1107_p10 = scmp.lt.s32.totalorder %s1327_s21, 2  ;;  %s187_s7 = sand.u32 1, %s1323_s20  }
   0xe   : > { %p1416_p11 = por %p149_p7, %p35_p0  ;;  %p1420_p12 = por %p155_p8, %p41_p3 }
   0xf   : > { %s1066_s8 = sshll.u32 %s1327_s21, 6  ;;  %s928_s9 = sshll.u32 %s187_s7, 6 }
  0x10   : > { %s197_s12 = scalar_lea.hbm %s1757_s0, %s1066_s8  ;;  %s191_s14 = scalar_lea.vmem [#allocation3], %s928_s9 }
  0x11   : > { %s198_s13 = sshll.u32 %s197_s12, 4  ;;  %s200_s15 = sshll.u32 %s191_s14, 4  ;;  %s199_s13 = int_to_ptr.hbm [resolvable:$true] %s198_s13  ;;  %s201_s15 = int_to_ptr.vmem [resolvable:$true] %s200_s15 }
  0x12   : > { %p1431_p13 = pnand %p1107_p10, %p1405_p5  ;;  %p932_p0 = scmp.ge.s32.totalorder %s1327_s21, 1 }
  0x13   : > { %p208_p1 = scmp.lt.s32.totalorder %s1327_s21, 3  ;;  %s188_s17 = scalar_lea.sflag [#allocation4], %s187_s7 }
  0x14   : > { %s1231_s23 = sshra.s32 %s199_s13, 4  ;;  %p1235_p3 = pneg %p1431_p13  ;;  %s1232_s23 = int_to_ptr.hbm [resolvable:$true] %s1231_s23 }
  0x15   : > { %s1233_s25 = scalar_lea.hbm %s1232_s23, 64  ;;  %s1238_s28 = scalar_lea.hbm %s1757_s0, 128 }
  0x16   : > { %p1234_p2 = scmp.ne.s32.totalorder %s1232_s23, %s1233_s25  ;;  %p1239_p5 = scmp.lt.s32.totalorder %s1232_s23, %s1757_s0 }
  0x17   : > { %p1240_p8 = scmp.lt.s32.totalorder %s1238_s28, %s1233_s25 }
  0x18   : > { %p1236_p4 = pnand %p1235_p3, %p1234_p2 }
  0x19   : > { %p1241_p10 = por %p1240_p8, %p1239_p5 }
  0x1a   : > { %p1237_p7 = pneg %p1236_p4 }
  0x1c   : > { %p1242_p9 = pnand %p1241_p10, %p1237_p7 }
  0x1e   : > { %1245 = shalt.err (!%p1242_p9)
}
  0x1f   : > { %s1329_s7 = smov 128   ;;  %s1330_s11 = smov 8  }
  0x20   : > { %1102 = dma.hbm_to_vmem [thread:$0]  (!%p1431_p13), %s199_s13, 1024, %s201_s15, %s188_s17, %s1329_s7, %s1329_s7, %s1330_s11  }
  0x21   : > { %p209_p2 = pnand %p932_p0, %p208_p1 }
  0x22   : > { %s1452_s12 = sand.u32 (!%p209_p2), 1, %s1319_s19  }
  0x23   : > { %212 = sbr.rel (%p209_p2) target bundleno = 639 (0x27f), region = 40  ;;  %s933_s14 = sshll.u32 (!%p209_p2), %s1452_s12, 6 }
  0x24   : > { %s215_s23 = scalar_lea.sflag (!%p209_p2), [#allocation4], %s1452_s12  ;;  %s218_s25 = scalar_lea.vmem (!%p209_p2), [#allocation3], %s933_s14 }
  0x28   : > { %1306 = dma.done.wait (%p1409_p6), %s215_s23, 1024  }
  0x29   : > { %1308 = vsyncadd (%p1409_p6), %s215_s23, 4294966272  ;;  %v1462_v0 = vld [vmem:[%s218_s25 + $0x30] sm:$0xff]  ;;  %v1464_v1 = vld [vmem:[%s218_s25 + $0x38] sm:$0xff]  ;;  %s1331_s29 = smov 127   ;;  %s1332_s13 = smov 1   ;;  %v260_v24 = vlaneseq  ;;  %v1333_v52 = vmov 0  }
  0x2a   : > { %v1466_v2 = vld [vmem:[%s218_s25] sm:$0xff]  ;;  %v324_v3 = vmax.f32 %v1462_v0, 0.0  ;;  %v328_v4 = vmax.f32 %v1464_v1, 0.0  ;;  %v1470_v5 = vld [vmem:[%s218_s25 + $0x8] sm:$0xff]  ;;  %v1473_v7 = vld [vmem:[%s218_s25 + $0x10] sm:$0xff]  ;;  %1189 = vset.pattern.permute.xlu0 %v1333_v52  ;;  %1188 = vset.pattern.permute.xlu2 %v1333_v52  ;;  %vm510_vm9 = vcmask 392192  }
  0x2b   : > { %v321_v6 = vmax.f32 %v1466_v2, 0.0  ;;  %v1475_v8 = vld [vmem:[%s218_s25 + $0x18] sm:$0xff]  ;;  %v325_v9 = vmax.f32 %v1470_v5, 0.0  ;;  %v322_v10 = vmax.f32 %v1473_v7, 0.0  ;;  %v1480_v12 = vld [vmem:[%s218_s25 + $0x20] sm:$0xff]  ;;  %v1482_v13 = vld [vmem:[%s218_s25 + $0x28] sm:$0xff]  ;;  %1230 = vset.pattern.permute.xlu1 %v1333_v52 }
  0x2c   : > { %v326_v11 = vmax.f32 %v1475_v8, 0.0  ;;  %v1158_v14 = vpack.i.bf16 %v328_v4, %v324_v3  ;;  %v323_v15 = vmax.f32 %v1480_v12, 0.0  ;;  %v327_v16 = vmax.f32 %v1482_v13, 0.0  ;;  %v434_v45 = vld [vmem:[%s1759_s2 + $0x8] sm:$0xff]  ;;  %v433_v46 = vld [vmem:[%s1759_s2] sm:$0xff]  ;;  %s1281_s7 = scalar_lea.hbm %s1762_s5, 128 }
  0x2d   : > { %v1148_v17 = vpack.i.bf16 %v325_v9, %v321_v6  ;;  %v370_v18 = vpack.c.bf16 %v322_v10, %v321_v6  ;;  %v1494_v25 = vand.u32 127, %v260_v24 }
  0x2e   : > { %v372_v19 = vpack.c.bf16 %v326_v11, %v325_v9  ;;  %1159 = vrot.lane.b32.xlu1 %v1158_v14, %s1331_s29  ;;  %v373_v20 = vpack.c.bf16 %v328_v4, %v327_v16  ;;  %v371_v21 = vpack.c.bf16 %v324_v3, %v323_v15  ;;  %v1168_v22 = vpack.i.bf16 %v326_v11, %v322_v10 }
  0x2f   : > { %1149 = vrot.lane.b32.xlu0 %v1148_v17, %s1331_s29  ;;  %374 = vst [vmem:[#allocation2 + $0x20] sm:$0xff] %v370_v18  ;;  %v1153_v23 = vpack.i.bf16 %v327_v16, %v323_v15  ;;  %v1499_v27 = vadd.s32 384, %v1494_v25  ;;  %v262_v30 = vadd.s32 128, %v1494_v25  ;;  %v263_v31 = vadd.s32 256, %v1494_v25 }
  0x30   : > { %376 = vst [vmem:[#allocation2 + $0x30] sm:$0xff] %v372_v19  ;;  %1169 = vrot.lane.b32.xlu2 %v1168_v22, %s1332_s13  ;;  %vm317_vm0 = vcmp.lt.s32.totalorder %v1494_v25, 127  ;;  %vm345_vm2 = vcmp.lt.s32.totalorder %v1494_v25, 1  ;;  %vm313_vm7 = vcmp.ge.s32.totalorder %v1494_v25, 1 }
  0x31   : > { %377 = vst [vmem:[#allocation2 + $0x38] sm:$0xff] %v373_v20  ;;  %v290_v32 = vand.u32 127, %v1499_v27  ;;  %v276_v35 = vand.u32 127, %v262_v30  ;;  %v283_v36 = vand.u32 127, %v263_v31 }
  0x32   : > { %375 = vst [vmem:[#allocation2 + $0x28] sm:$0xff] %v371_v21 }
  0x33   : > { %vm1505_vm1 = vcmp.lt.s32.totalorder %v290_v32, 127  ;;  %vm1522_vm3 = vcmp.lt.s32.totalorder %v276_v35, 127  ;;  %vm1526_vm4 = vcmp.lt.s32.totalorder %v283_v36, 127  ;;  %vm1562_vm5 = vcmp.ge.s32.totalorder %v283_v36, 1 }
  0x34   : > { %vm1570_vm6 = vcmp.ge.s32.totalorder %v276_v35, 1  ;;  %vm1575_vm8 = vcmp.ge.s32.totalorder %v290_v32, 1 }
  0x36   : > { %1164 = vrot.lane.b32.xlu1 %v1168_v22, %s1331_s29 }
  0x37   : > { %1154 = vrot.lane.b32.xlu0 %v1153_v23, %s1331_s29  ;;  %v1073_v52 = vld [vmem:[#allocation2 + $0x2c] sm:$0xf0] }
  0x38   : > { %1174 = vrot.lane.b32.xlu2 %v1153_v23, %s1332_s13 }
  0x3e   : > { %1184 = vrot.lane.b32.xlu1 %v1148_v17, %s1332_s13 }
  0x3f   : > { %1179 = vrot.lane.b32.xlu0 %v1158_v14, %s1332_s13 }
  0x40   : > { %437 = vperm.xlu2 %1188, %v433_v46  }
  0x47   : > { %442 = vperm.xlu0 %1189, %v434_v45   ;;  %v963_v45 = vld [vmem:[#allocation2 + $0x20] sm:$0xf] }
  0x8a   : > { %v1496_v26 = vpop.permute.xlu2 %1169 }
  0x8b   : > { %v1172_v42 = vunpack.i.h.bf16 %v1496_v26  ;;  %v1171_v43 = vunpack.i.l.bf16 %v1496_v26 }
  0x92   : > { %v1510_v40 = vpop.permute.xlu2 %1174 }
  0x93   : > { %v1177_v55 = vunpack.i.h.bf16 %v1510_v40  ;;  %v1176_v56 = vunpack.i.l.bf16 %v1510_v40 }
  0x95   : > { %v348_v21 = vsel %vm345_vm2, %v1171_v43, %v1176_v56  ;;  %v349_v22 = vsel %vm345_vm2, %v1172_v42, %v1177_v55 }
  0xa0   : > { %v1160_v28 = vpop.permute.xlu1 %1159 }
  0xa1   : > { %v1150_v29 = vpop.permute.xlu0 %1149  ;;  %v1162_v33 = vunpack.i.h.bf16 %v1160_v28  ;;  %v1161_v37 = vunpack.i.l.bf16 %v1160_v28 }
  0xa2   : > { %v1152_v34 = vunpack.i.h.bf16 %v1150_v29  ;;  %v1151_v39 = vunpack.i.l.bf16 %v1150_v29 }
  0xa4   : > { %v402_v41 = vsel %vm317_vm0, %v1162_v33, %v1152_v34  ;;  %v401_v58 = vsel %vm317_vm0, %v1161_v37, %v1151_v39 }
  0xa5   : > { %v410_v57 = vsel %vm1505_vm1, %v402_v41, 0.0  ;;  %v406_v11 = vsel %vm1505_vm1, %v401_v58, 0.0 }
  0xa8   : > { %v1165_v44 = vpop.permute.xlu1 %1164 }
  0xa9   : > { %v1167_v47 = vunpack.i.h.bf16 %v1165_v44  ;;  %v1166_v48 = vunpack.i.l.bf16 %v1165_v44  ;;  %v1155_v51 = vpop.permute.xlu0 %1154 }
  0xaa   : > { %v1157_v53 = vunpack.i.h.bf16 %v1155_v51  ;;  %v1156_v54 = vunpack.i.l.bf16 %v1155_v51 }
  0xab   : > { %v399_v59 = vsel %vm317_vm0, %v1151_v39, %v1166_v48  ;;  %v400_v60 = vsel %vm317_vm0, %v1152_v34, %v1167_v47  ;;  %v360_v34 = vsel %vm1562_vm5, %v349_v22, 0.0 }
  0xac   : > { %v403_v61 = vsel %vm317_vm0, %v399_v59, 0.0  ;;  %v407_v62 = vsel %vm317_vm0, %v400_v60, 0.0  ;;  %v396_v63 = vsel %vm317_vm0, %v1157_v53, %v1162_v33  ;;  %v398_v3 = vsel %vm317_vm0, %v1167_v47, %v1157_v53  ;;  %v1071_v53 = vld [vmem:[#allocation2 + $0x24] sm:$0xf]  ;;  %v965_v59 = vld [vmem:[#allocation2 + $0x30] sm:$0xf0] }
  0xad   : > { %v408_v4 = vsel %vm1522_vm3, %v398_v3, 0.0  ;;  %v409_v6 = vsel %vm1526_vm4, %v396_v63, 0.0  ;;  %v395_v9 = vsel %vm317_vm0, %v1156_v54, %v1161_v37  ;;  %v397_v10 = vsel %vm317_vm0, %v1166_v48, %v1156_v54  ;;  %v1072_v63 = vld [vmem:[#allocation2 + $0x2c] sm:$0xf]  ;;  %v973_v3 = vld [vmem:[#allocation2 + $0x38] sm:$0xf0] }
  0xae   : > { %v404_v14 = vsel %vm1522_vm3, %v397_v10, 0.0  ;;  %v405_v15 = vsel %vm1526_vm4, %v395_v9, 0.0  ;;  %v413_v16 = vpack.c.bf16 %v408_v4, %v407_v62  ;;  %v414_v19 = vpack.c.bf16 %v410_v57, %v409_v6  ;;  %v1074_v62 = vld [vmem:[#allocation2 + $0x34] sm:$0xf0] }
  0xaf   : > { %v411_v17 = vpack.c.bf16 %v404_v14, %v403_v61  ;;  %v412_v18 = vpack.c.bf16 %v406_v11, %v405_v15  ;;  %v356_v33 = vsel %vm1562_vm5, %v348_v21, 0.0  ;;  %v971_v61 = vld [vmem:[#allocation2 + $0x28] sm:$0xf]  ;;  %v964_v15 = vor.u32 %v1073_v52, %v963_v45 }
  0xb0   : > { %417 = vst [vmem:[#allocation2 + $0x50] sm:$0xff] %v413_v16  ;;  %v1185_v23 = vpop.permute.xlu1 %1184  ;;  %v976_v21 = vor.u32 %v1072_v63, %v973_v3 }
  0xb1   : > { %415 = vst [vmem:[#allocation2 + $0x40] sm:$0xff] %v411_v17  ;;  %v1187_v26 = vunpack.i.h.bf16 %v1185_v23  ;;  %v1186_v27 = vunpack.i.l.bf16 %v1185_v23  ;;  %v1180_v28 = vpop.permute.xlu0 %1179 }
  0xb2   : > { %416 = vst [vmem:[#allocation2 + $0x48] sm:$0xff] %v412_v18  ;;  %v1182_v30 = vunpack.i.h.bf16 %v1180_v28  ;;  %v1181_v31 = vunpack.i.l.bf16 %v1180_v28  ;;  %v968_v18 = vor.u32 %v1071_v53, %v965_v59 }
  0xb3   : > { %418 = vst [vmem:[#allocation2 + $0x58] sm:$0xff] %v414_v19  ;;  %v351_v35 = vsel %vm345_vm2, %v1187_v26, %v1172_v42  ;;  %v350_v36 = vsel %vm345_vm2, %v1186_v27, %v1171_v43  ;;  %v972_v19 = vor.u32 %v1074_v62, %v971_v61 }
  0xb4   : > { %v359_v32 = vsel %vm1570_vm6, %v351_v35, 0.0  ;;  %v355_v37 = vsel %vm1570_vm6, %v350_v36, 0.0  ;;  %v347_v39 = vsel %vm345_vm2, %v1177_v55, %v1182_v30  ;;  %v353_v40 = vsel %vm345_vm2, %v1182_v30, %v1187_v26 }
  0xb5   : > { %v358_v41 = vsel %vm313_vm7, %v353_v40, 0.0  ;;  %v361_v42 = vsel %vm1575_vm8, %v347_v39, 0.0  ;;  %v346_v43 = vsel %vm345_vm2, %v1176_v56, %v1181_v31  ;;  %v352_v44 = vsel %vm345_vm2, %v1181_v31, %v1186_v27  ;;  %v438_v39 = vpop.permute.xlu2 %437 }
  0xb6   : > { %v364_v46 = vpack.c.bf16 %v359_v32, %v358_v41  ;;  %v365_v47 = vpack.c.bf16 %v361_v42, %v360_v34  ;;  %v354_v48 = vsel %vm313_vm7, %v352_v44, 0.0  ;;  %v357_v51 = vsel %vm1575_vm8, %v346_v43, 0.0 }
  0xb7   : > { %v362_v54 = vpack.c.bf16 %v355_v37, %v354_v48  ;;  %v363_v55 = vpack.c.bf16 %v357_v51, %v356_v33  ;;  %v1077_v57 = vld [vmem:[#allocation2 + $0x4c] sm:$0xf0]  ;;  %v981_v58 = vld [vmem:[#allocation2 + $0x50] sm:$0xf0]  ;;  %v1079_v37 = vld [vmem:[%s1758_s1] sm:$0xff] }
  0xb8   : > { %368 = vst [vmem:[#allocation2 + $0x10] sm:$0xff] %v364_v46  ;;  %v979_v56 = vld [vmem:[#allocation2 + $0x40] sm:$0xf]  ;;  %v1075_v60 = vld [vmem:[#allocation2 + $0x44] sm:$0xf] }
  0xb9   : > { %369 = vst [vmem:[#allocation2 + $0x18] sm:$0xff] %v365_v47  ;;  %v980_v4 = vor.u32 %v1077_v57, %v979_v56  ;;  %v984_v6 = vor.u32 %v1075_v60, %v981_v58  ;;  %v987_v9 = vld [vmem:[#allocation2 + $0x48] sm:$0xf]  ;;  %v1076_v10 = vld [vmem:[#allocation2 + $0x4c] sm:$0xf]  ;;  %v443_v47 = vpop.permute.xlu0 %442 }
  0xba   : > { %366 = vst [vmem:[#allocation2] sm:$0xff] %v362_v54  ;;  %v1078_v11 = vld [vmem:[#allocation2 + $0x54] sm:$0xf0]  ;;  %v989_v14 = vld [vmem:[#allocation2 + $0x58] sm:$0xf0] }
  0xbb   : > { %367 = vst [vmem:[#allocation2 + $0x8] sm:$0xff] %v363_v55  ;;  %519 = vmatpush.bf16.msra.mxu0 %v980_v4  ;;  %533 = vmatpush.bf16.msra.mxu1 %v984_v6  ;;  %v988_v16 = vor.u32 %v1078_v11, %v987_v9  ;;  %v992_v17 = vor.u32 %v1076_v10, %v989_v14 }
  0xbd   : > { %547 = vmatpush.bf16.msra.mxu2 %v988_v16  ;;  %561 = vmatpush.bf16.msra.mxu3 %v992_v17 }
  0xbf   : > { %520 = vmatpush.bf16.msra.mxu0 %v964_v15  ;;  %534 = vmatpush.bf16.msra.mxu1 %v968_v18  ;;  %v1069_v22 = vld [vmem:[#allocation2 + $0xc] sm:$0xf0]  ;;  %v949_v23 = vld [vmem:[#allocation2 + $0x10] sm:$0xf0] }
  0xc0   : > { %v1070_v26 = vld [vmem:[#allocation2 + $0x14] sm:$0xf0]  ;;  %v957_v27 = vld [vmem:[#allocation2 + $0x18] sm:$0xf0] }
  0xc1   : > { %548 = vmatpush.bf16.msra.mxu2 %v972_v19  ;;  %562 = vmatpush.bf16.msra.mxu3 %v976_v21  ;;  %v947_v28 = vld [vmem:[#allocation2] sm:$0xf]  ;;  %v1067_v30 = vld [vmem:[#allocation2 + $0x4] sm:$0xf]  ;;  %v681_v19 = vld [vmem:[%s1761_s4 + $0x8] sm:$0xff] }
  0xc2   : > { %v948_v31 = vor.u32 %v1069_v22, %v947_v28  ;;  %v952_v33 = vor.u32 %v1067_v30, %v949_v23  ;;  %v955_v34 = vld [vmem:[#allocation2 + $0x8] sm:$0xf]  ;;  %v1068_v35 = vld [vmem:[#allocation2 + $0xc] sm:$0xf] }
  0xc3   : > { %v956_v36 = vor.u32 %v1070_v26, %v955_v34  ;;  %v960_v32 = vor.u32 %v1068_v35, %v957_v27 }
  0xc4   : > { %521 = vmatpush.bf16.msra.mxu0 %v948_v31  ;;  %535 = vmatpush.bf16.msra.mxu1 %v952_v33 }
  0xc5   : > { %549 = vmatpush.bf16.msra.mxu2 %v956_v36  ;;  %563 = vmatpush.bf16.msra.mxu3 %v960_v32 }
  0xc7   : > { %993 = vmatmul.msk.bf16.vlgmr.msra.gmra.mxu0 %vm510_vm9, %v1079_v37  ;;  %994 = vmatmul.msk.bf16.vlgmr.msra.gmra.mxu1 %vm510_vm9, %v1079_v37 }
  0xc8   : > { %995 = vmatmul.msk.bf16.vlgmr.msra.gmra.mxu2 %vm510_vm9, %v1079_v37  ;;  %996 = vmatmul.msk.bf16.vlgmr.msra.gmra.mxu3 %vm510_vm9, %v1079_v37 }
 0x144   : > { %v523_v40 = vpop.f32.mrf.mxu0  ;;  %v537_v41 = vpop.f32.mrf.mxu1 }
 0x145   : > { %v524_v42 = vadd.f32 %v523_v40, %v438_v39  ;;  %v538_v43 = vadd.f32 %v537_v41, %v438_v39 }
 0x147   : > { %v570_v44 = vmax.f32 %v524_v42, 0.0  ;;  %v571_v45 = vmax.f32 %v538_v43, 0.0 }
 0x149   : > { %v618_v46 = vpack.c.bf16 %v571_v45, %v570_v44 }
 0x14b   : > { %622 = vst [vmem:[#allocation2 + $0x20] sm:$0xff] %v618_v46  ;;  %v551_v48 = vpop.f32.mrf.mxu2  ;;  %v565_v51 = vpop.f32.mrf.mxu3 }
 0x14c   : > { %v552_v52 = vadd.f32 %v551_v48, %v438_v39  ;;  %v566_v53 = vadd.f32 %v565_v51, %v438_v39  ;;  %v525_v54 = vpop.f32.mrf.mxu0  ;;  %v539_v55 = vpop.f32.mrf.mxu1 }
 0x14d   : > { %v526_v57 = vadd.f32 %v525_v54, %v443_v47  ;;  %v540_v58 = vadd.f32 %v539_v55, %v443_v47 }
 0x14e   : > { %v572_v59 = vmax.f32 %v552_v52, 0.0  ;;  %v573_v56 = vmax.f32 %v566_v53, 0.0 }
 0x14f   : > { %v574_v60 = vmax.f32 %v526_v57, 0.0  ;;  %v575_v61 = vmax.f32 %v540_v58, 0.0 }
 0x150   : > { %v619_v62 = vpack.c.bf16 %v573_v56, %v572_v59 }
 0x151   : > { %v620_v63 = vpack.c.bf16 %v575_v61, %v574_v60  ;;  %v1190_v3 = vpack.i.bf16 %v574_v60, %v570_v44  ;;  %v1200_v4 = vpack.i.bf16 %v575_v61, %v571_v45  ;;  %v680_v45 = vld [vmem:[%s1761_s4] sm:$0xff] }
 0x152   : > { %623 = vst [vmem:[#allocation2 + $0x28] sm:$0xff] %v619_v62 }
 0x153   : > { %624 = vst [vmem:[#allocation2 + $0x30] sm:$0xff] %v620_v63  ;;  %v553_v6 = vpop.f32.mrf.mxu2  ;;  %v567_v9 = vpop.f32.mrf.mxu3  ;;  %1191 = vrot.lane.b32.xlu1 %v1190_v3, %s1331_s29  ;;  %1201 = vrot.lane.b32.xlu0 %v1200_v4, %s1332_s13 }
 0x154   : > { %v554_v10 = vadd.f32 %v553_v6, %v443_v47  ;;  %v568_v11 = vadd.f32 %v567_v9, %v443_v47  ;;  %1196 = vrot.lane.b32.xlu2 %v1200_v4, %s1331_s29 }
 0x156   : > { %v576_v14 = vmax.f32 %v554_v10, 0.0  ;;  %v577_v15 = vmax.f32 %v568_v11, 0.0 }
 0x158   : > { %v621_v16 = vpack.c.bf16 %v577_v15, %v576_v14  ;;  %v1210_v17 = vpack.i.bf16 %v577_v15, %v573_v56  ;;  %v1205_v18 = vpack.i.bf16 %v576_v14, %v572_v59 }
 0x15a   : > { %625 = vst [vmem:[#allocation2 + $0x38] sm:$0xff] %v621_v16  ;;  %v1086_v14 = vld [vmem:[#allocation2 + $0x2c] sm:$0xf0] }
 0x15b   : > { %1211 = vrot.lane.b32.xlu1 %v1210_v17, %s1331_s29  ;;  %1226 = vrot.lane.b32.xlu0 %v1190_v3, %s1332_s13 }
 0x15c   : > { %1206 = vrot.lane.b32.xlu2 %v1205_v18, %s1331_s29  ;;  %s1707_s29 = scalar_lea.vmem [#allocation6], %s933_s14  ;;  %s1094_s14 = sshll.u32 %s1387_s22, 6 }
 0x15d   : > { %s848_s16 = scalar_lea.hbm %s1762_s5, %s1094_s14  ;;  %s849_s17 = sshll.u32 %s1707_s29, 4  ;;  %s850_s17 = int_to_ptr.vmem [resolvable:$true] %s849_s17 }
 0x15e   : > { %s851_s26 = sshll.u32 %s848_s16, 4  ;;  %s836_s22 = scalar_lea.sflag [#allocation5], %s1452_s12  ;;  %s852_s26 = int_to_ptr.hbm [resolvable:$true] %s851_s26 }
 0x15f   : > { %s1275_s8 = sshra.s32 %s852_s26, 4  ;;  %s1276_s8 = int_to_ptr.hbm [resolvable:$true] %s1275_s8 }
 0x160   : > { %s1277_s28 = scalar_lea.hbm %s1276_s8, 64  ;;  %p1282_p0 = scmp.lt.s32.totalorder %s1276_s8, %s1762_s5 }
 0x161   : > { %v1087_v20 = vld [vmem:[#allocation2 + $0x34] sm:$0xf0]  ;;  %v1029_v29 = vld [vmem:[#allocation2 + $0x38] sm:$0xf0]  ;;  %p1278_p6 = scmp.ne.s32.totalorder %s1276_s8, %s1277_s28  ;;  %p1283_p1 = scmp.lt.s32.totalorder %s1281_s7, %s1277_s28 }
 0x163   : > { %1216 = vrot.lane.b32.xlu1 %v1205_v18, %s1332_s13  ;;  %p1279_p9 = pnand %p1278_p6, %p1416_p11  ;;  %p1284_p3 = por %p1283_p1, %p1282_p0 }
 0x164   : > { %1221 = vrot.lane.b32.xlu2 %v1210_v17, %s1332_s13 }
 0x165   : > { %p1280_p13 = pneg %p1279_p9 }
 0x167   : > { %p1285_p4 = pnand %p1284_p3, %p1280_p13 }
 0x16b   : > { %684 = vperm.xlu1 %1230, %v680_v45  }
 0x16c   : > { %689 = vperm.xlu2 %1188, %v681_v19  }
 0x1ae   : > { %v1197_v21 = vpop.permute.xlu2 %1196 }
 0x1af   : > { %v1199_v27 = vunpack.i.h.bf16 %v1197_v21  ;;  %v1198_v28 = vunpack.i.l.bf16 %v1197_v21 }
 0x1b6   : > { %v1207_v22 = vpop.permute.xlu2 %1206 }
 0x1b7   : > { %v1209_v23 = vunpack.i.h.bf16 %v1207_v22  ;;  %v1208_v26 = vunpack.i.l.bf16 %v1207_v22 }
 0x1b9   : > { %v644_v33 = vsel %vm317_vm0, %v1198_v28, %v1208_v26  ;;  %v645_v34 = vsel %vm317_vm0, %v1199_v27, %v1209_v23 }
 0x1ba   : > { %v651_v39 = vsel %vm1522_vm3, %v644_v33, 0.0  ;;  %v655_v40 = vsel %vm1522_vm3, %v645_v34, 0.0  ;;  %v1019_v34 = vld [vmem:[#allocation2 + $0x20] sm:$0xf] }
 0x1be   : > { %v1222_v46 = vpop.permute.xlu2 %1221 }
 0x1bf   : > { %v1224_v54 = vunpack.i.h.bf16 %v1222_v46  ;;  %v1223_v55 = vunpack.i.l.bf16 %v1222_v46 }
 0x1c5   : > { %v1192_v30 = vpop.permute.xlu1 %1191  ;;  %v1625_v31 = vpop.permute.xlu0 %1201 }
 0x1c6   : > { %v1194_v35 = vunpack.i.h.bf16 %v1192_v30  ;;  %v1193_v36 = vunpack.i.l.bf16 %v1192_v30  ;;  %v1204_v57 = vunpack.i.h.bf16 %v1625_v31  ;;  %v1203_v58 = vunpack.i.l.bf16 %v1625_v31 }
 0x1c8   : > { %v646_v32 = vsel %vm317_vm0, %v1193_v36, %v1198_v28  ;;  %v647_v37 = vsel %vm317_vm0, %v1194_v35, %v1199_v27 }
 0x1c9   : > { %v650_v41 = vsel %vm317_vm0, %v646_v32, 0.0  ;;  %v654_v42 = vsel %vm317_vm0, %v647_v37, 0.0 }
 0x1ca   : > { %v658_v43 = vpack.c.bf16 %v651_v39, %v650_v41  ;;  %v660_v44 = vpack.c.bf16 %v655_v40, %v654_v42  ;;  %v1021_v40 = vld [vmem:[#allocation2 + $0x30] sm:$0xf0] }
 0x1cc   : > { %662 = vst [vmem:[#allocation2 + $0x40] sm:$0xff] %v658_v43 }
 0x1cd   : > { %664 = vst [vmem:[#allocation2 + $0x50] sm:$0xff] %v660_v44  ;;  %v1212_v47 = vpop.permute.xlu1 %1211  ;;  %v1227_v48 = vpop.permute.xlu0 %1226 }
 0x1ce   : > { %v1214_v49 = vunpack.i.h.bf16 %v1212_v47  ;;  %v1213_v51 = vunpack.i.l.bf16 %v1212_v47  ;;  %v1229_v52 = vunpack.i.h.bf16 %v1227_v48  ;;  %v1228_v53 = vunpack.i.l.bf16 %v1227_v48  ;;  %v1084_v47 = vld [vmem:[#allocation2 + $0x24] sm:$0xf] }
 0x1cf   : > { %v1024_v25 = vor.u32 %v1084_v47, %v1021_v40 }
 0x1d0   : > { %v642_v59 = vsel %vm317_vm0, %v1208_v26, %v1213_v51  ;;  %v643_v56 = vsel %vm317_vm0, %v1209_v23, %v1214_v49  ;;  %v648_v60 = vsel %vm317_vm0, %v1213_v51, %v1193_v36  ;;  %v649_v61 = vsel %vm317_vm0, %v1214_v49, %v1194_v35 }
 0x1d1   : > { %v652_v62 = vsel %vm1526_vm4, %v642_v59, 0.0  ;;  %v653_v63 = vsel %vm1505_vm1, %v648_v60, 0.0  ;;  %v656_v3 = vsel %vm1526_vm4, %v643_v56, 0.0  ;;  %v657_v4 = vsel %vm1505_vm1, %v649_v61, 0.0  ;;  %v1027_v61 = vld [vmem:[#allocation2 + $0x28] sm:$0xf] }
 0x1d2   : > { %v659_v6 = vpack.c.bf16 %v653_v63, %v652_v62  ;;  %v661_v9 = vpack.c.bf16 %v657_v4, %v656_v3  ;;  %v598_v10 = vsel %vm345_vm2, %v1228_v53, %v1203_v58  ;;  %v599_v11 = vsel %vm345_vm2, %v1229_v52, %v1204_v57  ;;  %v1085_v62 = vld [vmem:[#allocation2 + $0x2c] sm:$0xf]  ;;  %v1092_v63 = vld [vmem:[%s1760_s3] sm:$0xff] }
 0x1d3   : > { %v600_v15 = vsel %vm345_vm2, %v1223_v55, %v1228_v53  ;;  %v601_v16 = vsel %vm345_vm2, %v1224_v54, %v1229_v52  ;;  %v603_v50 = vsel %vm1570_vm6, %v598_v10, 0.0  ;;  %v607_v38 = vsel %vm1570_vm6, %v599_v11, 0.0  ;;  %v1035_v17 = vld [vmem:[#allocation2 + $0x40] sm:$0xf]  ;;  %v1088_v18 = vld [vmem:[#allocation2 + $0x44] sm:$0xf] }
 0x1d4   : > { %663 = vst [vmem:[#allocation2 + $0x48] sm:$0xff] %v659_v6  ;;  %v602_v19 = vsel %vm313_vm7, %v600_v15, 0.0  ;;  %v606_v21 = vsel %vm313_vm7, %v601_v16, 0.0  ;;  %v1090_v22 = vld [vmem:[#allocation2 + $0x4c] sm:$0xf0]  ;;  %v1020_v35 = vor.u32 %v1086_v14, %v1019_v34  ;;  %v1028_v3 = vor.u32 %v1087_v20, %v1027_v61 }
 0x1d5   : > { %665 = vst [vmem:[#allocation2 + $0x58] sm:$0xff] %v661_v9  ;;  %v610_v23 = vpack.c.bf16 %v603_v50, %v602_v19  ;;  %v612_v26 = vpack.c.bf16 %v607_v38, %v606_v21  ;;  %v1217_v27 = vpop.permute.xlu1 %1216  ;;  %v1036_v28 = vor.u32 %v1090_v22, %v1035_v17  ;;  %v1037_v30 = vld [vmem:[#allocation2 + $0x50] sm:$0xf0]  ;;  %v1032_v4 = vor.u32 %v1085_v62, %v1029_v29  ;;  %v690_v22 = vpop.permute.xlu2 %689 }
 0x1d6   : > { %v1219_v31 = vunpack.i.h.bf16 %v1217_v27  ;;  %v1218_v33 = vunpack.i.l.bf16 %v1217_v27  ;;  %v1040_v24 = vor.u32 %v1088_v18, %v1037_v30 }
 0x1d7   : > { %614 = vst [vmem:[#allocation2] sm:$0xff] %v610_v23  ;;  %765 = vmatpush.bf16.msrb.mxu0 %v1036_v28 }
 0x1d8   : > { %616 = vst [vmem:[#allocation2 + $0x10] sm:$0xff] %v612_v26  ;;  %v594_v36 = vsel %vm345_vm2, %v1218_v33, %v1223_v55  ;;  %v595_v32 = vsel %vm345_vm2, %v1219_v31, %v1224_v54  ;;  %v596_v37 = vsel %vm345_vm2, %v1203_v58, %v1218_v33  ;;  %v597_v39 = vsel %vm345_vm2, %v1204_v57, %v1219_v31 }
 0x1d9   : > { %v604_v41 = vsel %vm1562_vm5, %v596_v37, 0.0  ;;  %v605_v42 = vsel %vm1575_vm8, %v594_v36, 0.0  ;;  %v608_v43 = vsel %vm1562_vm5, %v597_v39, 0.0  ;;  %v609_v44 = vsel %vm1575_vm8, %v595_v32, 0.0  ;;  %779 = vmatpush.bf16.msrb.mxu1 %v1040_v24 }
 0x1da   : > { %v611_v45 = vpack.c.bf16 %v605_v42, %v604_v41  ;;  %v613_v46 = vpack.c.bf16 %v609_v44, %v608_v43 }
 0x1db   : > { %766 = vmatpush.bf16.msrb.mxu0 %v1020_v35  ;;  %v1043_v48 = vld [vmem:[#allocation2 + $0x48] sm:$0xf]  ;;  %v1089_v49 = vld [vmem:[#allocation2 + $0x4c] sm:$0xf] }
 0x1dc   : > { %615 = vst [vmem:[#allocation2 + $0x8] sm:$0xff] %v611_v45  ;;  %v1091_v51 = vld [vmem:[#allocation2 + $0x54] sm:$0xf0]  ;;  %v1045_v52 = vld [vmem:[#allocation2 + $0x58] sm:$0xf0] }
 0x1dd   : > { %617 = vst [vmem:[#allocation2 + $0x18] sm:$0xff] %v613_v46  ;;  %780 = vmatpush.bf16.msrb.mxu1 %v1024_v25  ;;  %v1044_v53 = vor.u32 %v1091_v51, %v1043_v48  ;;  %v1048_v54 = vor.u32 %v1089_v49, %v1045_v52  ;;  %v685_v16 = vpop.permute.xlu1 %684 }
 0x1de   : > { %v1003_v55 = vld [vmem:[#allocation2] sm:$0xf]  ;;  %v1080_v57 = vld [vmem:[#allocation2 + $0x4] sm:$0xf] }
 0x1df   : > { %v1082_v58 = vld [vmem:[#allocation2 + $0xc] sm:$0xf0]  ;;  %v1005_v59 = vld [vmem:[#allocation2 + $0x10] sm:$0xf0]  ;;  %793 = vmatpush.bf16.msrb.mxu2 %v1044_v53  ;;  %807 = vmatpush.bf16.msrb.mxu3 %v1048_v54 }
 0x1e0   : > { %v1004_v56 = vor.u32 %v1082_v58, %v1003_v55  ;;  %v1008_v60 = vor.u32 %v1080_v57, %v1005_v59 }
 0x1e2   : > { %767 = vmatpush.bf16.msrb.mxu0 %v1004_v56  ;;  %781 = vmatpush.bf16.msrb.mxu1 %v1008_v60 }
 0x1e3   : > { %794 = vmatpush.bf16.msrb.mxu2 %v1028_v3  ;;  %808 = vmatpush.bf16.msrb.mxu3 %v1032_v4  ;;  %v1011_v6 = vld [vmem:[#allocation2 + $0x8] sm:$0xf]  ;;  %v1081_v9 = vld [vmem:[#allocation2 + $0xc] sm:$0xf] }
 0x1e4   : > { %v1083_v10 = vld [vmem:[#allocation2 + $0x14] sm:$0xf0]  ;;  %v1013_v11 = vld [vmem:[#allocation2 + $0x18] sm:$0xf0] }
 0x1e5   : > { %1049 = vmatmul.msk.bf16.vlgmr.msrb.gmra.mxu0 %vm510_vm9, %v1092_v63  ;;  %1050 = vmatmul.msk.bf16.vlgmr.msrb.gmra.mxu1 %vm510_vm9, %v1092_v63  ;;  %v1012_v14 = vor.u32 %v1083_v10, %v1011_v6  ;;  %v1016_v15 = vor.u32 %v1081_v9, %v1013_v11 }
 0x1e7   : > { %795 = vmatpush.bf16.msrb.mxu2 %v1012_v14  ;;  %809 = vmatpush.bf16.msrb.mxu3 %v1016_v15 }
 0x1ea   : > { %1051 = vmatmul.msk.bf16.vlgmr.msrb.gmra.mxu2 %vm510_vm9, %v1092_v63  ;;  %1052 = vmatmul.msk.bf16.vlgmr.msrb.gmra.mxu3 %vm510_vm9, %v1092_v63 }
 0x262   : > { %v769_v50 = vpop.f32.mrf.mxu0  ;;  %v783_v38 = vpop.f32.mrf.mxu1 }
 0x263   : > { %v770_v17 = vadd.f32 %v769_v50, %v685_v16  ;;  %v784_v18 = vadd.f32 %v783_v38, %v685_v16 }
 0x265   : > { %v816_v19 = vadd.f32 %v770_v17, %v1466_v2  ;;  %v817_v21 = vadd.f32 %v1473_v7, %v784_v18 }
 0x267   : > { %824 = vst [vmem:[%s1707_s29] sm:$0xff] %v816_v19 }
 0x268   : > { %1053 = vst [vmem:[%s1707_s29 + $0x10] sm:$0xff] %v817_v21 }
 0x26a   : > { %v771_v23 = vpop.f32.mrf.mxu0  ;;  %v785_v26 = vpop.f32.mrf.mxu1 }
 0x26b   : > { %v772_v27 = vadd.f32 %v771_v23, %v690_v22  ;;  %v786_v2 = vadd.f32 %v785_v26, %v690_v22 }
 0x26d   : > { %v820_v7 = vadd.f32 %v772_v27, %v1470_v5  ;;  %v821_v28 = vadd.f32 %v1475_v8, %v786_v2  ;;  %v797_v30 = vpop.f32.mrf.mxu2  ;;  %v811_v31 = vpop.f32.mrf.mxu3 }
 0x26e   : > { %v798_v33 = vadd.f32 %v797_v30, %v685_v16  ;;  %v812_v24 = vadd.f32 %v811_v31, %v685_v16 }
 0x26f   : > { %825 = vst [vmem:[%s1707_s29 + $0x8] sm:$0xff] %v820_v7 }
 0x270   : > { %1054 = vst [vmem:[%s1707_s29 + $0x18] sm:$0xff] %v821_v28  ;;  %v818_v34 = vadd.f32 %v1480_v12, %v798_v33  ;;  %v819_v35 = vadd.f32 %v1462_v0, %v812_v24 }
 0x272   : > { %1055 = vst [vmem:[%s1707_s29 + $0x20] sm:$0xff] %v818_v34 }
 0x273   : > { %1057 = vst [vmem:[%s1707_s29 + $0x30] sm:$0xff] %v819_v35 }
 0x275   : > { %v799_v5 = vpop.f32.mrf.mxu2  ;;  %v813_v8 = vpop.f32.mrf.mxu3 }
 0x276   : > { %v800_v36 = vadd.f32 %v799_v5, %v690_v22  ;;  %v814_v32 = vadd.f32 %v813_v8, %v690_v22 }
 0x278   : > { %v822_v12 = vadd.f32 %v1482_v13, %v800_v36  ;;  %v823_v0 = vadd.f32 %v1464_v1, %v814_v32 }
 0x27a   : > { %1056 = vst [vmem:[%s1707_s29 + $0x28] sm:$0xff] %v822_v12 }
 0x27b   : > { %1058 = vst [vmem:[%s1707_s29 + $0x38] sm:$0xff] %v823_v0 }
 0x27c   : > { %1288 = shalt.err (!%p1285_p4)
}
 0x27d   : > { %s1334_s12 = smov 128   ;;  %s1335_s25 = smov 8  }
 0x27e   : > { %1097 = dma.vmem_to_hbm [thread:$0]  (%p1416_p11), %s850_s17, 1024, %s852_s26, %s836_s22, %s1334_s12, %s1334_s12, %s1335_s25  }
 0x27f PF: > { %s866_s29 = sand.u32 1, %s1315_s18   ;;  %p1780_p7 = scmp.ge.s32.totalorder %s1327_s21, 2 }
 0x280   : > { %s867_s14 = scalar_lea.sflag [#allocation5], %s866_s29 }
 0x281   : > { %p1104_p5 = pnand %p1780_p7, %p1420_p12 }
 0x283   : > { %p1105_p8 = pneg %p1104_p5 }
 0x285   : > { %1310 = dma.done.wait (%p1105_p8), %s867_s14, 1024  }
 0x286   : > { %1312 = vsyncadd (%p1105_p8), %s867_s14, 4294966272  ;;  %p18_p10 = scmp.ge.s32.totalorder %s1391_s24, 4   ;;  %s1781_s18 = smov %s1319_s19 }
 0x287   : > { %s1782_s19 = smov %s1323_s20  ;;  %s1783_s20 = smov %s1403_s27 }
 0x288   : > { %s1784_s21 = smov %s1391_s24  ;;  %20 = sbr.rel (!%p18_p10) target bundleno = 5 (0x5), region = 91 }
 0x28d   :  { %873 = vsyncpa [#allocation4], 1 }
 0x28e   :  { %875 = vsyncpa [#allocation4 + $0x1], 1 }
 0x28f   :  { %876 = vsyncpa [#allocation5], 1 }
 0x290   :  { %878 = vsyncpa [#allocation5 + $0x1], 1 }

</bundles_post_ra>
